<compile_context>
chip_gen: v6e
topology: v6e:2x2x1
jax: 0.10.0
libtpu: 0.0.40
codegen_flags: <defaults>
</compile_context>

<pallas_src>
import functools
import math

import jax
import jax.numpy as jnp
import numpy as np
from jax.experimental import pallas as pl
from jax.experimental.pallas import tpu as pltpu

LANE = 128
SUBLANE = 8


def _round_up(n, m):
    return ((n + m - 1) // m) * m


# --------------------------------------------------------------------------- #
# Kernel
# --------------------------------------------------------------------------- #
def qnet_kernel(x_ref, w1_ref, b1_ref, w2_ref, b2_ref, w3_ref, b3_ref, out_ref):
    # x_ref: (bm, state_dim).  Transpose once (tiny, XLU slot is idle) so the
    # batch is the lane axis for the whole network; cast to the weight dtype
    # in-kernel (bf16 MXU inputs on v6e/v7x, no wrapper cast pass).
    x_t = x_ref[...].T.astype(w1_ref.dtype)                     # (state_dim, bm)

    # Layer 1: Linear + ReLU (MXU matmul, f32 accumulate; bias/ReLU in f32).
    h1 = jnp.dot(w1_ref[...], x_t, preferred_element_type=jnp.float32)   # (h_pad, bm)
    h1 = jnp.maximum(h1 + b1_ref[...], 0.0)

    # Layer 2: Linear + ReLU.
    h2 = jnp.dot(w2_ref[...], h1.astype(w2_ref.dtype),
                 preferred_element_type=jnp.float32)                     # (h_pad, bm)
    h2 = jnp.maximum(h2 + b2_ref[...], 0.0)

    # Layer 3: Linear (Q-values).  Output is (a_sub, bm): action rows on the
    # sublane axis, batch on lanes -> lane-dense, tiny writeback.
    q = jnp.dot(w3_ref[...], h2.astype(w3_ref.dtype),
                preferred_element_type=jnp.float32)                      # (a_sub, bm)
    out_ref[...] = (q + b3_ref[...]).astype(out_ref.dtype)


# --------------------------------------------------------------------------- #
# Wrapper
# --------------------------------------------------------------------------- #
def _resident_spec(shape, single_buffer=True):
    """Constant-index block: DMA'd once, stays VMEM-resident across all tiles."""
    index_map = lambda i: (0,) * len(shape)
    if single_buffer and hasattr(pl, "Buffered"):
        try:
            return pl.BlockSpec(shape, index_map, pipeline_mode=pl.Buffered(1))
        except TypeError:
            pass
    return pl.BlockSpec(shape, index_map)


def _pick_batch_tile(B, block_b):
    """Batch tile: full array for small B; otherwise a multiple of 128 (batch is
    the lane axis of the output) and at least 2 tiles so both v7x TCs engage."""
    if B <= LANE:
        return B
    half = (B + 1) // 2
    return max(LANE, min(_round_up(block_b, LANE), _round_up(half, LANE)))


@functools.partial(
    jax.jit,
    static_argnames=("action_dim", "block_b", "out_dtype", "single_buffer_weights"),
)
def q_network_forward(state, params, *, action_dim, block_b=2048,
                      out_dtype=jnp.float32, single_buffer_weights=True):
    """state: [B, state_dim] f32.  params: padded, feature-major weights/biases.

    Returns Q-values [B, action_dim] (out_dtype, default f32).
    """
    w1, b1 = params["w1"], params["b1"]
    w2, b2 = params["w2"], params["b2"]
    w3, b3 = params["w3"], params["b3"]

    B, state_dim = state.shape
    h_pad = w1.shape[0]
    a_sub = w3.shape[0]            # action_dim rounded up to 8 sublanes
    assert w1.shape[1] == state_dim, "state_dim mismatch vs params"
    assert action_dim <= a_sub

    bm = _pick_batch_tile(B, block_b)
    grid = (pl.cdiv(B, bm),)

    # VMEM footprint: x / out double-buffered by the pipeline, weights resident
    # (single-buffered), plus f32 intermediates.  Add headroom, cap at 64 MiB
    # (v7x physical VMEM per TensorCore).
    weight_bytes = sum(math.prod(p.shape) * p.dtype.itemsize
                       for p in (w1, b1, w2, b2, w3, b3))
    wbuf = 1 if single_buffer_weights else 2
    vmem_bytes = (2 * bm * state_dim * state.dtype.itemsize
                  + 2 * a_sub * bm * np.dtype(out_dtype).itemsize
                  + wbuf * weight_bytes
                  + 3 * bm * h_pad * 4)
    vmem_limit = int(min(max(vmem_bytes * 5 // 4 + (2 << 20), 16 << 20), 64 << 20))

    resident = functools.partial(_resident_spec, single_buffer=single_buffer_weights)

    out_t = pl.pallas_call(
        qnet_kernel,
        out_shape=jax.ShapeDtypeStruct((a_sub, B), out_dtype),
        grid=grid,
        in_specs=[
            pl.BlockSpec((bm, state_dim), lambda i: (i, 0)),
            resident(w1.shape), resident(b1.shape),
            resident(w2.shape), resident(b2.shape),
            resident(w3.shape), resident(b3.shape),
        ],
        out_specs=pl.BlockSpec((a_sub, bm), lambda i: (0, i)),
        compiler_params=pltpu.CompilerParams(
            dimension_semantics=("parallel",),
            vmem_limit_bytes=vmem_limit,
        ),
    )(state, w1, b1, w2, b2, w3, b3)

    # (a_sub, B) -> (B, action_dim): tiny pass (~16 B/row) vs. the old padded
    # (B, 128) slice (~512 B/row).
    return out_t[:action_dim, :].T


_SINGLE_BUFFER_OK = None


def q_network(state, params, *, action_dim, **kwargs):
    """Robust entry point: prefer single-buffered resident weights, fall back to
    default double-buffering if this JAX build rejects pipeline_mode."""
    global _SINGLE_BUFFER_OK
    if _SINGLE_BUFFER_OK is None:
        try:
            out = q_network_forward(state, params, action_dim=action_dim,
                                    single_buffer_weights=True, **kwargs)
            jax.block_until_ready(out)
            _SINGLE_BUFFER_OK = True
            return out
        except Exception:
            _SINGLE_BUFFER_OK = False
    return q_network_forward(state, params, action_dim=action_dim,
                             single_buffer_weights=_SINGLE_BUFFER_OK, **kwargs)


# --------------------------------------------------------------------------- #
# Params & reference
# --------------------------------------------------------------------------- #
def init_params(key, state_dim, action_dim, hidden_dim, dtype=jnp.float32):
    """PyTorch nn.Linear init (U(-1/sqrt(fan_in), +)), kept in native
    (out_features, in_features) layout; hidden padded to 128 lanes, action rows
    padded to 8 sublanes (padded entries are exactly zero).  Weights may be
    stored bf16 (dtype=jnp.bfloat16); biases stay f32."""
    h_pad = _round_up(hidden_dim, LANE)
    a_pad = _round_up(action_dim, SUBLANE)
    ks = jax.random.split(key, 6)

    def linear(kw, kb, fan_in, fan_out, in_pad, out_pad):
        bound = 1.0 / math.sqrt(fan_in)
        w = jax.random.uniform(kw, (fan_out, fan_in), jnp.float32, -bound, bound)
        b = jax.random.uniform(kb, (fan_out, 1), jnp.float32, -bound, bound)
        w = jnp.pad(w, ((0, out_pad - fan_out), (0, in_pad - fan_in))).astype(dtype)
        b = jnp.pad(b, ((0, out_pad - fan_out), (0, 0)))      # f32 biases
        return w, b

    w1, b1 = linear(ks[0], ks[1], state_dim, hidden_dim, state_dim, h_pad)
    w2, b2 = linear(ks[2], ks[3], hidden_dim, hidden_dim, h_pad, h_pad)
    w3, b3 = linear(ks[4], ks[5], hidden_dim, action_dim, h_pad, a_pad)
    return {"w1": w1, "b1": b1, "w2": w2, "b2": b2, "w3": w3, "b3": b3}


def q_network_reference(state, p, state_dim, action_dim, hidden_dim):
    """Pure-JAX reference on the UNPADDED sub-matrices (true PyTorch semantics)."""
    w1 = p["w1"][:hidden_dim, :state_dim].astype(jnp.float32)
    b1 = p["b1"][:hidden_dim, 0]
    w2 = p["w2"][:hidden_dim, :hidden_dim].astype(jnp.float32)
    b2 = p["b2"][:hidden_dim, 0]
    w3 = p["w3"][:action_dim, :hidden_dim].astype(jnp.float32)
    b3 = p["b3"][:action_dim, 0]
    h1 = jnp.maximum(state @ w1.T + b1, 0.0)
    h2 = jnp.maximum(h1 @ w2.T + b2, 0.0)
    return h2 @ w3.T + b3


# --------------------------------------------------------------------------- #
# Self-test
# --------------------------------------------------------------------------- #
if __name__ == "__main__":
    key = jax.random.PRNGKey(0)
    k_state, k_params, k_state2, k_params2 = jax.random.split(key, 4)

    # 1) Small f32 test (single tile).
    B, state_dim, action_dim, hidden_dim = 8, 16, 4, 32
    state = jax.random.normal(k_state, (B, state_dim), dtype=jnp.float32)
    params = init_params(k_params, state_dim, action_dim, hidden_dim)

    q_vals = jax.block_until_ready(q_network(state, params, action_dim=action_dim))
    ref = q_network_reference(state, params, state_dim, action_dim, hidden_dim)
    assert q_vals.shape == (B, action_dim), q_vals.shape
    assert jnp.allclose(q_vals, ref, atol=1e-5, rtol=1e-5), "f32 mismatch vs reference"

    # 2) Multi-tile / ragged batch (grid >= 2 lane-dense 128-multiple tiles).
    B2, sd2, ad2, hd2 = 300, 24, 6, 64
    state2 = jax.random.normal(k_state2, (B2, sd2), dtype=jnp.float32)
    params2 = init_params(k_params2, sd2, ad2, hd2)
    q2 = jax.block_until_ready(q_network(state2, params2, action_dim=ad2))
    ref2 = q_network_reference(state2, params2, sd2, ad2, hd2)
    assert q2.shape == (B2, ad2), q2.shape
    assert jnp.allclose(q2, ref2, atol=1e-4, rtol=1e-4), "ragged-batch mismatch"

    # 3) bf16-weight path: bf16 MXU inputs, f32 accumulation / bias / ReLU.
    params_bf16 = init_params(k_params, state_dim, action_dim, hidden_dim,
                              dtype=jnp.bfloat16)
    q_bf16 = jax.block_until_ready(q_network(state, params_bf16, action_dim=action_dim))
    ref_bf16 = q_network_reference(state, params_bf16, state_dim, action_dim, hidden_dim)
    assert q_bf16.shape == (B, action_dim), q_bf16.shape
    assert jnp.allclose(q_bf16, ref_bf16, atol=5e-2, rtol=0), "bf16 mismatch"

    print("KERNEL_OK")
</pallas_src>

<mosaic_0001>
module attributes {stable_mosaic.version = 11 : i64} {
  func.func @qnet_kernel(%arg0: i32, %arg1: memref<8x16xf32, #tpu.memory_space<vmem>>, %arg2: memref<128x16xf32, #tpu.memory_space<vmem>>, %arg3: memref<128x1xf32, #tpu.memory_space<vmem>>, %arg4: memref<128x128xf32, #tpu.memory_space<vmem>>, %arg5: memref<128x1xf32, #tpu.memory_space<vmem>>, %arg6: memref<8x128xf32, #tpu.memory_space<vmem>>, %arg7: memref<8x1xf32, #tpu.memory_space<vmem>>, %arg8: memref<8x8xf32, #tpu.memory_space<vmem>>) attributes {dimension_semantics = [#tpu.dimension_semantics<parallel>], iteration_bounds = array<i64: 1>, scalar_prefetch = 0 : i64, scratch_operands = 0 : i64, tpu.core_type = #tpu.core_type<tc>, window_params = [{transform_indices = @transform_0, window_bounds = array<i64: 8, 16>}, {pipeline_mode = #tpu.pipeline_mode<synchronous>, transform_indices = @transform_1, window_bounds = array<i64: 128, 16>}, {pipeline_mode = #tpu.pipeline_mode<synchronous>, transform_indices = @transform_2, window_bounds = array<i64: 128, 1>}, {pipeline_mode = #tpu.pipeline_mode<synchronous>, transform_indices = @transform_3, window_bounds = array<i64: 128, 128>}, {pipeline_mode = #tpu.pipeline_mode<synchronous>, transform_indices = @transform_4, window_bounds = array<i64: 128, 1>}, {pipeline_mode = #tpu.pipeline_mode<synchronous>, transform_indices = @transform_5, window_bounds = array<i64: 8, 128>}, {pipeline_mode = #tpu.pipeline_mode<synchronous>, transform_indices = @transform_6, window_bounds = array<i64: 8, 1>}, {transform_indices = @transform_7, window_bounds = array<i64: 8, 8>}]} {
    %c0 = arith.constant 0 : index
    %c0_0 = arith.constant 0 : index
    %0 = vector.load %arg1[%c0, %c0_0] : memref<8x16xf32, #tpu.memory_space<vmem>>, vector<8x16xf32>
    %1 = tpu.transpose %0, [1, 0] : vector<8x16xf32> -> vector<16x8xf32>
    %c0_1 = arith.constant 0 : index
    %c0_2 = arith.constant 0 : index
    %2 = vector.load %arg2[%c0_1, %c0_2] : memref<128x16xf32, #tpu.memory_space<vmem>>, vector<128x16xf32>
    %cst = arith.constant dense<0.000000e+00> : vector<128x8xf32>
    %3 = tpu.matmul %2, %1, %cst {dimension_numbers = #tpu.dot_dimension_numbers<[1], [0], [0], [1], [0, 0, 1, 1], [], []>} : vector<128x16xf32>, vector<16x8xf32>, vector<128x8xf32> -> vector<128x8xf32>
    %c0_3 = arith.constant 0 : index
    %c0_4 = arith.constant 0 : index
    %4 = vector.load %arg3[%c0_3, %c0_4] : memref<128x1xf32, #tpu.memory_space<vmem>>, vector<128x1xf32>
    %5 = vector.broadcast %4 : vector<128x1xf32> to vector<128x8xf32>
    %6 = arith.addf %3, %5 : vector<128x8xf32>
    %cst_5 = arith.constant 0.000000e+00 : f32
    %7 = vector.broadcast %cst_5 : f32 to vector<128x8xf32>
    %8 = arith.maximumf %6, %7 : vector<128x8xf32>
    %c0_6 = arith.constant 0 : index
    %c0_7 = arith.constant 0 : index
    %9 = vector.load %arg4[%c0_6, %c0_7] : memref<128x128xf32, #tpu.memory_space<vmem>>, vector<128x128xf32>
    %cst_8 = arith.constant dense<0.000000e+00> : vector<128x8xf32>
    %10 = tpu.matmul %9, %8, %cst_8 {dimension_numbers = #tpu.dot_dimension_numbers<[1], [0], [0], [1], [0, 0, 1, 1], [], []>} : vector<128x128xf32>, vector<128x8xf32>, vector<128x8xf32> -> vector<128x8xf32>
    %c0_9 = arith.constant 0 : index
    %c0_10 = arith.constant 0 : index
    %11 = vector.load %arg5[%c0_9, %c0_10] : memref<128x1xf32, #tpu.memory_space<vmem>>, vector<128x1xf32>
    %12 = vector.broadcast %11 : vector<128x1xf32> to vector<128x8xf32>
    %13 = arith.addf %10, %12 : vector<128x8xf32>
    %cst_11 = arith.constant 0.000000e+00 : f32
    %14 = vector.broadcast %cst_11 : f32 to vector<128x8xf32>
    %15 = arith.maximumf %13, %14 : vector<128x8xf32>
    %c0_12 = arith.constant 0 : index
    %c0_13 = arith.constant 0 : index
    %16 = vector.load %arg6[%c0_12, %c0_13] : memref<8x128xf32, #tpu.memory_space<vmem>>, vector<8x128xf32>
    %cst_14 = arith.constant dense<0.000000e+00> : vector<8x8xf32>
    %17 = tpu.matmul %16, %15, %cst_14 {dimension_numbers = #tpu.dot_dimension_numbers<[1], [0], [0], [1], [0, 0, 1, 1], [], []>} : vector<8x128xf32>, vector<128x8xf32>, vector<8x8xf32> -> vector<8x8xf32>
    %c0_15 = arith.constant 0 : index
    %c0_16 = arith.constant 0 : index
    %18 = vector.load %arg7[%c0_15, %c0_16] : memref<8x1xf32, #tpu.memory_space<vmem>>, vector<8x1xf32>
    %19 = vector.broadcast %18 : vector<8x1xf32> to vector<8x8xf32>
    %20 = arith.addf %17, %19 : vector<8x8xf32>
    %c0_17 = arith.constant 0 : index
    %c0_18 = arith.constant 0 : index
    %21 = vector.load %arg8[%c0_17, %c0_18] : memref<8x8xf32, #tpu.memory_space<vmem>>, vector<8x8xf32>
    tpu.vector_store %arg8[%c0_17, %c0_18], %20 {strides = array<i32>} : memref<8x8xf32, #tpu.memory_space<vmem>>, vector<8x8xf32>,
    return
  }
  func.func @transform_0(%arg0: i32) -> (i32, i32) {
    %c0_i32 = arith.constant 0 : i32
    %c0_i32_0 = arith.constant 0 : i32
    return %arg0, %c0_i32 : i32, i32
  }
  func.func @transform_1(%arg0: i32) -> (i32, i32) {
    %c0_i32 = arith.constant 0 : i32
    %c0_i32_0 = arith.constant 0 : i32
    %c0_i32_1 = arith.constant 0 : i32
    return %c0_i32, %c0_i32_0 : i32, i32
  }
  func.func @transform_2(%arg0: i32) -> (i32, i32) {
    %c0_i32 = arith.constant 0 : i32
    %c0_i32_0 = arith.constant 0 : i32
    %c0_i32_1 = arith.constant 0 : i32
    return %c0_i32, %c0_i32_0 : i32, i32
  }
  func.func @transform_3(%arg0: i32) -> (i32, i32) {
    %c0_i32 = arith.constant 0 : i32
    %c0_i32_0 = arith.constant 0 : i32
    %c0_i32_1 = arith.constant 0 : i32
    return %c0_i32, %c0_i32_0 : i32, i32
  }
  func.func @transform_4(%arg0: i32) -> (i32, i32) {
    %c0_i32 = arith.constant 0 : i32
    %c0_i32_0 = arith.constant 0 : i32
    %c0_i32_1 = arith.constant 0 : i32
    return %c0_i32, %c0_i32_0 : i32, i32
  }
  func.func @transform_5(%arg0: i32) -> (i32, i32) {
    %c0_i32 = arith.constant 0 : i32
    %c0_i32_0 = arith.constant 0 : i32
    %c0_i32_1 = arith.constant 0 : i32
    return %c0_i32, %c0_i32_0 : i32, i32
  }
  func.func @transform_6(%arg0: i32) -> (i32, i32) {
    %c0_i32 = arith.constant 0 : i32
    %c0_i32_0 = arith.constant 0 : i32
    %c0_i32_1 = arith.constant 0 : i32
    return %c0_i32, %c0_i32_0 : i32, i32
  }
  func.func @transform_7(%arg0: i32) -> (i32, i32) {
    %c0_i32 = arith.constant 0 : i32
    %c0_i32_0 = arith.constant 0 : i32
    return %c0_i32, %arg0 : i32, i32
  }
}

module attributes {stable_mosaic.version = 11 : i64} {
  func.func @qnet_kernel(%arg0: i32, %arg1: memref<8x16xf32, #tpu.memory_space<vmem>>, %arg2: memref<128x16xf32, #tpu.memory_space<vmem>>, %arg3: memref<128x1xf32, #tpu.memory_space<vmem>>, %arg4: memref<128x128xf32, #tpu.memory_space<vmem>>, %arg5: memref<128x1xf32, #tpu.memory_space<vmem>>, %arg6: memref<8x128xf32, #tpu.memory_space<vmem>>, %arg7: memref<8x1xf32, #tpu.memory_space<vmem>>, %arg8: memref<8x8xf32, #tpu.memory_space<vmem>>) attributes {dimension_semantics = [#tpu.dimension_semantics<parallel>], iteration_bounds = array<i64: 1>, scalar_prefetch = 0 : i64, scratch_operands = 0 : i64, tpu.core_type = #tpu.core_type<tc>, window_params = [{transform_indices = @transform_0, window_bounds = array<i64: 8, 16>}, {pipeline_mode = #tpu.pipeline_mode<synchronous>, transform_indices = @transform_1, window_bounds = array<i64: 128, 16>}, {pipeline_mode = #tpu.pipeline_mode<synchronous>, transform_indices = @transform_2, window_bounds = array<i64: 128, 1>}, {pipeline_mode = #tpu.pipeline_mode<synchronous>, transform_indices = @transform_3, window_bounds = array<i64: 128, 128>}, {pipeline_mode = #tpu.pipeline_mode<synchronous>, transform_indices = @transform_4, window_bounds = array<i64: 128, 1>}, {pipeline_mode = #tpu.pipeline_mode<synchronous>, transform_indices = @transform_5, window_bounds = array<i64: 8, 128>}, {pipeline_mode = #tpu.pipeline_mode<synchronous>, transform_indices = @transform_6, window_bounds = array<i64: 8, 1>}, {transform_indices = @transform_7, window_bounds = array<i64: 8, 8>}]} {
    %c0 = arith.constant 0 : index
    %c0_0 = arith.constant 0 : index
    %0 = vector.load %arg1[%c0, %c0_0] : memref<8x16xf32, #tpu.memory_space<vmem>>, vector<8x16xf32>
    %1 = tpu.transpose %0, [1, 0] : vector<8x16xf32> -> vector<16x8xf32>
    %c0_1 = arith.constant 0 : index
    %c0_2 = arith.constant 0 : index
    %2 = vector.load %arg2[%c0_1, %c0_2] : memref<128x16xf32, #tpu.memory_space<vmem>>, vector<128x16xf32>
    %cst = arith.constant dense<0.000000e+00> : vector<128x8xf32>
    %3 = tpu.matmul %2, %1, %cst {dimension_numbers = #tpu.dot_dimension_numbers<[1], [0], [0], [1], [0, 0, 1, 1], [], []>} : vector<128x16xf32>, vector<16x8xf32>, vector<128x8xf32> -> vector<128x8xf32>
    %c0_3 = arith.constant 0 : index
    %c0_4 = arith.constant 0 : index
    %4 = vector.load %arg3[%c0_3, %c0_4] : memref<128x1xf32, #tpu.memory_space<vmem>>, vector<128x1xf32>
    %5 = vector.broadcast %4 : vector<128x1xf32> to vector<128x8xf32>
    %6 = arith.addf %3, %5 : vector<128x8xf32>
    %cst_5 = arith.constant 0.000000e+00 : f32
    %7 = vector.broadcast %cst_5 : f32 to vector<128x8xf32>
    %8 = arith.maximumf %6, %7 : vector<128x8xf32>
    %c0_6 = arith.constant 0 : index
    %c0_7 = arith.constant 0 : index
    %9 = vector.load %arg4[%c0_6, %c0_7] : memref<128x128xf32, #tpu.memory_space<vmem>>, vector<128x128xf32>
    %cst_8 = arith.constant dense<0.000000e+00> : vector<128x8xf32>
    %10 = tpu.matmul %9, %8, %cst_8 {dimension_numbers = #tpu.dot_dimension_numbers<[1], [0], [0], [1], [0, 0, 1, 1], [], []>} : vector<128x128xf32>, vector<128x8xf32>, vector<128x8xf32> -> vector<128x8xf32>
    %c0_9 = arith.constant 0 : index
    %c0_10 = arith.constant 0 : index
    %11 = vector.load %arg5[%c0_9, %c0_10] : memref<128x1xf32, #tpu.memory_space<vmem>>, vector<128x1xf32>
    %12 = vector.broadcast %11 : vector<128x1xf32> to vector<128x8xf32>
    %13 = arith.addf %10, %12 : vector<128x8xf32>
    %cst_11 = arith.constant 0.000000e+00 : f32
    %14 = vector.broadcast %cst_11 : f32 to vector<128x8xf32>
    %15 = arith.maximumf %13, %14 : vector<128x8xf32>
    %c0_12 = arith.constant 0 : index
    %c0_13 = arith.constant 0 : index
    %16 = vector.load %arg6[%c0_12, %c0_13] : memref<8x128xf32, #tpu.memory_space<vmem>>, vector<8x128xf32>
    %cst_14 = arith.constant dense<0.000000e+00> : vector<8x8xf32>
    %17 = tpu.matmul %16, %15, %cst_14 {dimension_numbers = #tpu.dot_dimension_numbers<[1], [0], [0], [1], [0, 0, 1, 1], [], []>} : vector<8x128xf32>, vector<128x8xf32>, vector<8x8xf32> -> vector<8x8xf32>
    %c0_15 = arith.constant 0 : index
    %c0_16 = arith.constant 0 : index
    %18 = vector.load %arg7[%c0_15, %c0_16] : memref<8x1xf32, #tpu.memory_space<vmem>>, vector<8x1xf32>
    %19 = vector.broadcast %18 : vector<8x1xf32> to vector<8x8xf32>
    %20 = arith.addf %17, %19 : vector<8x8xf32>
    %c0_17 = arith.constant 0 : index
    %c0_18 = arith.constant 0 : index
    %21 = vector.load %arg8[%c0_17, %c0_18] : memref<8x8xf32, #tpu.memory_space<vmem>>, vector<8x8xf32>
    tpu.vector_store %arg8[%c0_17, %c0_18], %20 {strides = array<i32>} : memref<8x8xf32, #tpu.memory_space<vmem>>, vector<8x8xf32>,
    return
  }
  func.func @transform_0(%arg0: i32) -> (i32, i32) {
    %c0_i32 = arith.constant 0 : i32
    %c0_i32_0 = arith.constant 0 : i32
    return %arg0, %c0_i32 : i32, i32
  }
  func.func @transform_1(%arg0: i32) -> (i32, i32) {
    %c0_i32 = arith.constant 0 : i32
    %c0_i32_0 = arith.constant 0 : i32
    %c0_i32_1 = arith.constant 0 : i32
    return %c0_i32, %c0_i32_0 : i32, i32
  }
  func.func @transform_2(%arg0: i32) -> (i32, i32) {
    %c0_i32 = arith.constant 0 : i32
    %c0_i32_0 = arith.constant 0 : i32
    %c0_i32_1 = arith.constant 0 : i32
    return %c0_i32, %c0_i32_0 : i32, i32
  }
  func.func @transform_3(%arg0: i32) -> (i32, i32) {
    %c0_i32 = arith.constant 0 : i32
    %c0_i32_0 = arith.constant 0 : i32
    %c0_i32_1 = arith.constant 0 : i32
    return %c0_i32, %c0_i32_0 : i32, i32
  }
  func.func @transform_4(%arg0: i32) -> (i32, i32) {
    %c0_i32 = arith.constant 0 : i32
    %c0_i32_0 = arith.constant 0 : i32
    %c0_i32_1 = arith.constant 0 : i32
    return %c0_i32, %c0_i32_0 : i32, i32
  }
  func.func @transform_5(%arg0: i32) -> (i32, i32) {
    %c0_i32 = arith.constant 0 : i32
    %c0_i32_0 = arith.constant 0 : i32
    %c0_i32_1 = arith.constant 0 : i32
    return %c0_i32, %c0_i32_0 : i32, i32
  }
  func.func @transform_6(%arg0: i32) -> (i32, i32) {
    %c0_i32 = arith.constant 0 : i32
    %c0_i32_0 = arith.constant 0 : i32
    %c0_i32_1 = arith.constant 0 : i32
    return %c0_i32, %c0_i32_0 : i32, i32
  }
  func.func @transform_7(%arg0: i32) -> (i32, i32) {
    %c0_i32 = arith.constant 0 : i32
    %c0_i32_0 = arith.constant 0 : i32
    return %c0_i32, %arg0 : i32, i32
  }
}

</mosaic_0001>

<bundles_post_ra>
// kernel: q_network_forward.1
= control target key start
LH: loop header
LB: loop body
LE: loop exit
PB: predicated region body
PF: predicated region fallthrough
CT: control target
= control target key end

     0   :  { %vm139_vm0 = vcmask 130048   ;;  %v913_v2 = vmov 0   ;;  %vm915_vm1 = vmmov 0   ;;  %vm702_vm2 = vcmask 64512   ;;  %s1219_s0 = inlined_call_operand.vmem [shape: f32[8,16], index: 0, kind: input, shape index: {}]   ;;  %s1220_s1 = inlined_call_operand.vmem [shape: f32[128,16], index: 1, kind: input, shape index: {}]   ;;  %s1221_s2 = inlined_call_operand.vmem [shape: f32[128,1], index: 2, kind: input, shape index: {}]   ;;  %s1222_s4 = inlined_call_operand.vmem [shape: f32[128,1], index: 4, kind: input, shape index: {}]   ;;  %s1223_s6 = inlined_call_operand.vmem [shape: f32[8,1], index: 6, kind: input, shape index: {}]   ;;  %s1224_s3 = inlined_call_operand.vmem [shape: f32[128,128], index: 3, kind: input, shape index: {}]   ;;  %s1225_s5 = inlined_call_operand.vmem [shape: f32[8,128], index: 5, kind: input, shape index: {}]   ;;  %s1226_s7 = inlined_call_operand.vmem [shape: f32[8,8], index: 7, kind: output, shape index: {}]  }
   0x1   :  { %v26_v0 = vld [vmem:[%s1219_s0] sm:$0xff]  ;;  %911 = vset.pattern.permute.xlu0 %v913_v2  ;;  %912 = vset.pattern.permute.xlu1 %v913_v2  ;;  %v28_v3 = vld [vmem:[%s1220_s1 + $0x8] sm:$0xff]  ;;  %v29_v4 = vld [vmem:[%s1220_s1 + $0x10] sm:$0xff] }
   0x2   :  { %v27_v1 = vld [vmem:[%s1220_s1] sm:$0xff]  ;;  %791 = vmatprep.subr.msk.mxu0 %vm139_vm0, %v26_v0  ;;  %v58_v5 = vld [vmem:[%s1221_s2 + $0x78] sm:$0xff]  ;;  %v56_v7 = vld [vmem:[%s1221_s2 + $0x68] sm:$0xff] }
   0x3   :  { %793 = vmatprep.mubr.msk.f32.mxu0 %vm139_vm0, %v27_v1  ;;  %792 = vmatpush3.xpose.msk.msra.mxu0 %vm139_vm0, %v26_v0  ;;  %v30_v6 = vld [vmem:[%s1220_s1 + $0x18] sm:$0xff]  ;;  %v31_v8 = vld [vmem:[%s1220_s1 + $0x20] sm:$0xff]  ;;  %v57_v9 = vld [vmem:[%s1221_s2 + $0x70] sm:$0xff] }
   0x4   :  { %136 = vperm.xlu0 %911, %v58_v5   ;;  %126 = vperm.xlu1 %912, %v56_v7   ;;  %v55_v10 = vld [vmem:[%s1221_s2 + $0x60] sm:$0xff]  ;;  %v32_v11 = vld [vmem:[%s1220_s1 + $0x28] sm:$0xff]  ;;  %v33_v12 = vld [vmem:[%s1220_s1 + $0x30] sm:$0xff] }
   0x5   :  { %v54_v13 = vld [vmem:[%s1221_s2 + $0x58] sm:$0xff]  ;;  %v53_v14 = vld [vmem:[%s1221_s2 + $0x50] sm:$0xff]  ;;  %v35_v16 = vld [vmem:[%s1220_s1 + $0x40] sm:$0xff] }
   0x6   :  { %794 = vmatmul.mubr.msk.f32.vlgmr.msra.gmra.mxu0 %vm139_vm0, %v28_v3  ;;  %v34_v15 = vld [vmem:[%s1220_s1 + $0x38] sm:$0xff]  ;;  %v52_v17 = vld [vmem:[%s1221_s2 + $0x48] sm:$0xff]  ;;  %v51_v18 = vld [vmem:[%s1221_s2 + $0x40] sm:$0xff] }
   0x7   :  { %796 = vmatprep.mubr.msk.f32.mxu0 %vm139_vm0, %v29_v4  ;;  %v36_v19 = vld [vmem:[%s1220_s1 + $0x48] sm:$0xff]  ;;  %v37_v20 = vld [vmem:[%s1220_s1 + $0x50] sm:$0xff]  ;;  %v50_v21 = vld [vmem:[%s1221_s2 + $0x38] sm:$0xff] }
   0x8   :  { %131 = vperm.xlu0 %911, %v57_v9   ;;  %121 = vperm.xlu1 %912, %v55_v10   ;;  %v49_v22 = vld [vmem:[%s1221_s2 + $0x30] sm:$0xff]  ;;  %v38_v23 = vld [vmem:[%s1220_s1 + $0x58] sm:$0xff]  ;;  %v39_v24 = vld [vmem:[%s1220_s1 + $0x60] sm:$0xff] }
   0x9   :  { %v48_v25 = vld [vmem:[%s1221_s2 + $0x28] sm:$0xff]  ;;  %v47_v26 = vld [vmem:[%s1221_s2 + $0x20] sm:$0xff]  ;;  %v41_v28 = vld [vmem:[%s1220_s1 + $0x70] sm:$0xff] }
   0xa   :  { %797 = vmatmul.mubr.msk.f32.gmra.mxu0 %vm139_vm0, %v30_v6  ;;  %v40_v27 = vld [vmem:[%s1220_s1 + $0x68] sm:$0xff]  ;;  %v46_v29 = vld [vmem:[%s1221_s2 + $0x18] sm:$0xff]  ;;  %v45_v30 = vld [vmem:[%s1221_s2 + $0x10] sm:$0xff] }
   0xb   :  { %799 = vmatprep.mubr.msk.f32.mxu0 %vm139_vm0, %v31_v8  ;;  %v42_v31 = vld [vmem:[%s1220_s1 + $0x78] sm:$0xff]  ;;  %v44_v32 = vld [vmem:[%s1221_s2 + $0x8] sm:$0xff]  ;;  %v43_v33 = vld [vmem:[%s1221_s2] sm:$0xff] }
   0xc   :  { %116 = vperm.xlu0 %911, %v54_v13   ;;  %111 = vperm.xlu1 %912, %v53_v14   ;;  %v383_v34 = vld [vmem:[%s1222_s4 + $0x78] sm:$0xff]  ;;  %v382_v35 = vld [vmem:[%s1222_s4 + $0x70] sm:$0xff]  ;;  %v381_v36 = vld [vmem:[%s1222_s4 + $0x68] sm:$0xff] }
   0xd   :  { %v380_v37 = vld [vmem:[%s1222_s4 + $0x60] sm:$0xff]  ;;  %v379_v38 = vld [vmem:[%s1222_s4 + $0x58] sm:$0xff]  ;;  %v378_v39 = vld [vmem:[%s1222_s4 + $0x50] sm:$0xff] }
   0xe   :  { %800 = vmatmul.mubr.msk.f32.gmra.mxu0 %vm139_vm0, %v32_v11  ;;  %v377_v40 = vld [vmem:[%s1222_s4 + $0x48] sm:$0xff]  ;;  %v376_v41 = vld [vmem:[%s1222_s4 + $0x40] sm:$0xff]  ;;  %v375_v42 = vld [vmem:[%s1222_s4 + $0x38] sm:$0xff] }
   0xf   :  { %802 = vmatprep.mubr.msk.f32.mxu0 %vm139_vm0, %v33_v12  ;;  %v374_v43 = vld [vmem:[%s1222_s4 + $0x30] sm:$0xff]  ;;  %v373_v44 = vld [vmem:[%s1222_s4 + $0x28] sm:$0xff]  ;;  %v372_v45 = vld [vmem:[%s1222_s4 + $0x20] sm:$0xff] }
  0x10   :  { %106 = vperm.xlu0 %911, %v52_v17   ;;  %101 = vperm.xlu1 %912, %v51_v18   ;;  %v371_v46 = vld [vmem:[%s1222_s4 + $0x18] sm:$0xff]  ;;  %v370_v47 = vld [vmem:[%s1222_s4 + $0x10] sm:$0xff]  ;;  %v369_v48 = vld [vmem:[%s1222_s4 + $0x8] sm:$0xff] }
  0x11   :  { %v368_v49 = vld [vmem:[%s1222_s4] sm:$0xff] }
  0x12   :  { %803 = vmatmul.mubr.msk.f32.gmra.mxu0 %vm139_vm0, %v34_v15  ;;  %v626_v50 = vld [vmem:[%s1223_s6] sm:$0xff] }
  0x13   :  { %805 = vmatprep.mubr.msk.f32.mxu0 %vm139_vm0, %v35_v16  ;;  %v352_v51 = vld [vmem:[%s1224_s3] sm:$0xff] }
  0x14   :  { %96 = vperm.xlu0 %911, %v50_v21   ;;  %91 = vperm.xlu1 %912, %v49_v22  }
  0x15   :  { %849 = vmatprep.mubr.f32.mxu1 %v352_v51 }
  0x16   :  { %806 = vmatmul.mubr.msk.f32.gmra.mxu0 %vm139_vm0, %v36_v19 }
  0x17   :  { %808 = vmatprep.mubr.msk.f32.mxu0 %vm139_vm0, %v37_v20 }
  0x18   :  { %86 = vperm.xlu0 %911, %v48_v25   ;;  %81 = vperm.xlu1 %912, %v47_v26  }
  0x1a   :  { %809 = vmatmul.mubr.msk.f32.gmra.mxu0 %vm139_vm0, %v38_v23 }
  0x1b   :  { %811 = vmatprep.mubr.msk.f32.mxu0 %vm139_vm0, %v39_v24 }
  0x1c   :  { %76 = vperm.xlu0 %911, %v46_v29   ;;  %71 = vperm.xlu1 %912, %v45_v30  }
  0x1e   :  { %812 = vmatmul.mubr.msk.f32.gmra.mxu0 %vm139_vm0, %v40_v27 }
  0x1f   :  { %814 = vmatprep.mubr.msk.f32.mxu0 %vm139_vm0, %v41_v28 }
  0x20   :  { %66 = vperm.xlu0 %911, %v44_v32   ;;  %61 = vperm.xlu1 %912, %v43_v33  }
  0x22   :  { %815 = vmatmul.mubr.msk.f32.gmra.mxu0 %vm139_vm0, %v42_v31 }
  0x24   :  { %461 = vperm.xlu0 %911, %v383_v34   ;;  %456 = vperm.xlu1 %912, %v382_v35  }
  0x28   :  { %451 = vperm.xlu0 %911, %v381_v36   ;;  %446 = vperm.xlu1 %912, %v380_v37  }
  0x2c   :  { %441 = vperm.xlu0 %911, %v379_v38   ;;  %436 = vperm.xlu1 %912, %v378_v39  }
  0x30   :  { %431 = vperm.xlu0 %911, %v377_v40   ;;  %426 = vperm.xlu1 %912, %v376_v41  }
  0x34   :  { %421 = vperm.xlu0 %911, %v375_v42   ;;  %416 = vperm.xlu1 %912, %v374_v43  }
  0x38   :  { %411 = vperm.xlu0 %911, %v373_v44   ;;  %406 = vperm.xlu1 %912, %v372_v45  }
  0x3c   :  { %401 = vperm.xlu0 %911, %v371_v46   ;;  %396 = vperm.xlu1 %912, %v370_v47  }
  0x40   :  { %391 = vperm.xlu0 %911, %v369_v48   ;;  %386 = vperm.xlu1 %912, %v368_v49  }
  0x44   :  { %629 = vperm.xlu0 %911, %v626_v50  }
  0x7f   :  { %v137_v58 = vpop.permute.xlu0 %136  ;;  %v127_v60 = vpop.permute.xlu1 %126 }
  0x83   :  { %v132_v63 = vpop.permute.xlu0 %131  ;;  %v122_v1 = vpop.permute.xlu1 %121 }
  0x87   :  { %v117_v4 = vpop.permute.xlu0 %116  ;;  %v112_v6 = vpop.permute.xlu1 %111 }
  0x8b   :  { %v107_v10 = vpop.permute.xlu0 %106  ;;  %v102_v15 = vpop.permute.xlu1 %101 }
  0x8f   :  { %v97_v20 = vpop.permute.xlu0 %96  ;;  %v92_v23 = vpop.permute.xlu1 %91 }
  0x93   :  { %v87_v28 = vpop.permute.xlu0 %86  ;;  %v82_v31 = vpop.permute.xlu1 %81 }
  0x97   :  { %v77_v36 = vpop.permute.xlu0 %76  ;;  %v72_v39 = vpop.permute.xlu1 %71 }
  0x9b   :  { %v67_v44 = vpop.permute.xlu0 %66  ;;  %v62_v47 = vpop.permute.xlu1 %61 }
  0xc6   :  { %v1127_v52 = vpop.f32.mrf.mxu0 }
  0xc7   :  { %v263_v45 = vadd.f32 %v1127_v52, %v67_v44  ;;  %v354_v52 = vld [vmem:[%s1224_s3 + $0x10] sm:$0xff] }
  0xc8   :  { %v1129_v53 = vpop.f32.mrf.mxu0 }
  0xc9   :  { %v258_v48 = vadd.f32 %v1129_v53, %v62_v47  ;;  %v337_v50 = vmax.f32 %v263_v45, 0.0  ;;  %v355_v53 = vld [vmem:[%s1224_s3 + $0x18] sm:$0xff] }
  0xca   :  { %v1131_v54 = vpop.f32.mrf.mxu0 }
  0xcb   :  { %v273_v40 = vadd.f32 %v1131_v54, %v77_v36  ;;  %v336_v51 = vmax.f32 %v258_v48, 0.0  ;;  %v353_v54 = vld [vmem:[%s1224_s3 + $0x8] sm:$0xff] }
  0xcc   :  { %v1133_v55 = vpop.f32.mrf.mxu0 }
  0xcd   :  { %v268_v42 = vadd.f32 %v1133_v55, %v72_v39  ;;  %v339_v46 = vmax.f32 %v273_v40, 0.0  ;;  %v356_v55 = vld [vmem:[%s1224_s3 + $0x20] sm:$0xff] }
  0xce   :  { %v801_v56 = vpop.f32.mrf.mxu0 }
  0xcf   :  { %v283_v34 = vadd.f32 %v801_v56, %v87_v28  ;;  %v338_v49 = vmax.f32 %v268_v42, 0.0  ;;  %v357_v56 = vld [vmem:[%s1224_s3 + $0x28] sm:$0xff] }
  0xd0   :  { %v277_v57 = vpop.f32.mrf.mxu0 }
  0xd1   :  { %v278_v37 = vadd.f32 %v277_v57, %v82_v31  ;;  %v341_v41 = vmax.f32 %v283_v34, 0.0  ;;  %v358_v57 = vld [vmem:[%s1224_s3 + $0x30] sm:$0xff] }
  0xd2   :  { %v804_v59 = vpop.f32.mrf.mxu0 }
  0xd3   :  { %v293_v29 = vadd.f32 %v804_v59, %v97_v20  ;;  %v340_v43 = vmax.f32 %v278_v37, 0.0  ;;  %v360_v59 = vld [vmem:[%s1224_s3 + $0x40] sm:$0xff] }
  0xd4   :  { %v287_v61 = vpop.f32.mrf.mxu0 }
  0xd5   :  { %v288_v32 = vadd.f32 %v287_v61, %v92_v23  ;;  %v343_v35 = vmax.f32 %v293_v29, 0.0  ;;  %v362_v61 = vld [vmem:[%s1224_s3 + $0x50] sm:$0xff] }
  0xd6   :  { %v807_v62 = vpop.f32.mrf.mxu0 }
  0xd7   :  { %v303_v24 = vadd.f32 %v807_v62, %v107_v10  ;;  %v342_v38 = vmax.f32 %v288_v32, 0.0  ;;  %v363_v62 = vld [vmem:[%s1224_s3 + $0x58] sm:$0xff]  ;;  %v462_v10 = vpop.permute.xlu0 %461 }
  0xd8   :  { %v297_v0 = vpop.f32.mrf.mxu0 }
  0xd9   :  { %v298_v26 = vadd.f32 %v297_v0, %v102_v15  ;;  %v345_v30 = vmax.f32 %v303_v24, 0.0  ;;  %v365_v0 = vld [vmem:[%s1224_s3 + $0x68] sm:$0xff] }
  0xda   :  { %v810_v2 = vpop.f32.mrf.mxu0 }
  0xdb   :  { %v313_v18 = vadd.f32 %v810_v2, %v117_v4  ;;  %v344_v33 = vmax.f32 %v298_v26, 0.0  ;;  %v367_v2 = vld [vmem:[%s1224_s3 + $0x78] sm:$0xff]  ;;  %v452_v15 = vpop.permute.xlu0 %451 }
  0xdc   :  { %v307_v3 = vpop.f32.mrf.mxu0 }
  0xdd   :  { %v308_v21 = vadd.f32 %v307_v3, %v112_v6  ;;  %v347_v25 = vmax.f32 %v313_v18, 0.0  ;;  %v914_v3 = vmov 0.0  }
  0xde   :  { %v813_v5 = vpop.f32.mrf.mxu0  ;;  %873 = vmatprep.subr.mxu0 %v914_v3  ;;  %905 = vmatprep.mubr.msk.f32.mxu0 %vm915_vm1, %v914_v3 }
  0xdf   :  { %v323_v12 = vadd.f32 %v813_v5, %v127_v60  ;;  %v346_v27 = vmax.f32 %v308_v21, 0.0  ;;  %v361_v60 = vld [vmem:[%s1224_s3 + $0x48] sm:$0xff]  ;;  %v442_v20 = vpop.permute.xlu0 %441 }
  0xe0   :  { %v317_v7 = vpop.f32.mrf.mxu0 }
  0xe1   :  { %v318_v16 = vadd.f32 %v317_v7, %v122_v1  ;;  %v349_v19 = vmax.f32 %v323_v12, 0.0  ;;  %v366_v1 = vld [vmem:[%s1224_s3 + $0x70] sm:$0xff]  ;;  %v457_v12 = vpop.permute.xlu1 %456 }
  0xe2   :  { %v816_v8 = vpop.f32.mrf.mxu0 }
  0xe3   :  { %v333_v9 = vadd.f32 %v816_v8, %v137_v58  ;;  %v348_v22 = vmax.f32 %v318_v16, 0.0  ;;  %v359_v58 = vld [vmem:[%s1224_s3 + $0x38] sm:$0xff]  ;;  %v432_v26 = vpop.permute.xlu0 %431 }
  0xe4   :  { %v327_v11 = vpop.f32.mrf.mxu0 }
  0xe5   :  { %v351_v13 = vmax.f32 %v333_v9, 0.0  ;;  %v328_v14 = vadd.f32 %v327_v11, %v132_v63  ;;  %v364_v63 = vld [vmem:[%s1224_s3 + $0x60] sm:$0xff] }
  0xe7   :  { %v350_v17 = vmax.f32 %v328_v14, 0.0  ;;  %817 = vmatprep.subr.mxu1 %v351_v13  ;;  %v422_v36 = vpop.permute.xlu0 %421 }
  0xe8   :  { %818 = vmatpush3.msra.mxu1 %v351_v13 }
  0xe9   :  { %819 = vmatprep.subr.mxu1 %v350_v17 }
  0xea   :  { %820 = vmatpush3.msra.mxu1 %v350_v17  ;;  %v447_v17 = vpop.permute.xlu1 %446 }
  0xeb   :  { %821 = vmatprep.subr.mxu1 %v349_v19  ;;  %v412_v44 = vpop.permute.xlu0 %411 }
  0xec   :  { %822 = vmatpush3.msra.mxu1 %v349_v19 }
  0xed   :  { %823 = vmatprep.subr.mxu1 %v348_v22 }
  0xee   :  { %824 = vmatpush3.msra.mxu1 %v348_v22  ;;  %v437_v22 = vpop.permute.xlu1 %436 }
  0xef   :  { %825 = vmatprep.subr.mxu1 %v347_v25 }
  0xf0   :  { %826 = vmatpush3.msra.mxu1 %v347_v25 }
  0xf1   :  { %827 = vmatprep.subr.mxu1 %v346_v27 }
  0xf2   :  { %828 = vmatpush3.msra.mxu1 %v346_v27  ;;  %v427_v31 = vpop.permute.xlu1 %426 }
  0xf3   :  { %829 = vmatprep.subr.mxu1 %v345_v30 }
  0xf4   :  { %830 = vmatpush3.msra.mxu1 %v345_v30 }
  0xf5   :  { %831 = vmatprep.subr.mxu1 %v344_v33 }
  0xf6   :  { %832 = vmatpush3.msra.mxu1 %v344_v33  ;;  %v417_v39 = vpop.permute.xlu1 %416 }
  0xf7   :  { %833 = vmatprep.subr.mxu1 %v343_v35 }
  0xf8   :  { %834 = vmatpush3.msra.mxu1 %v343_v35 }
  0xf9   :  { %835 = vmatprep.subr.mxu1 %v342_v38 }
  0xfa   :  { %836 = vmatpush3.msra.mxu1 %v342_v38  ;;  %v407_v47 = vpop.permute.xlu1 %406 }
  0xfb   :  { %837 = vmatprep.subr.mxu1 %v341_v41 }
  0xfc   :  { %838 = vmatpush3.msra.mxu1 %v341_v41 }
  0xfd   :  { %839 = vmatprep.subr.mxu1 %v340_v43 }
  0xfe   :  { %840 = vmatpush3.msra.mxu1 %v340_v43 }
  0xff   :  { %841 = vmatprep.subr.mxu1 %v339_v46 }
 0x100   :  { %842 = vmatpush3.msra.mxu1 %v339_v46 }
 0x101   :  { %843 = vmatprep.subr.mxu1 %v338_v49 }
 0x102   :  { %844 = vmatpush3.msra.mxu1 %v338_v49 }
 0x103   :  { %845 = vmatprep.subr.mxu1 %v337_v50 }
 0x104   :  { %846 = vmatpush3.msra.mxu1 %v337_v50 }
 0x105   :  { %847 = vmatprep.subr.mxu1 %v336_v51 }
 0x106   :  { %848 = vmatpush3.msra.mxu1 %v336_v51 }
 0x107   :  { %850 = vmatmul.mubr.f32.vlgmr.msra.gmra.mxu1 %v353_v54  ;;  %v402_v54 = vpop.permute.xlu0 %401 }
 0x108   :  { %852 = vmatprep.mubr.f32.mxu1 %v354_v52 }
 0x10b   :  { %853 = vmatmul.mubr.f32.gmra.mxu1 %v355_v53 }
 0x10c   :  { %855 = vmatprep.mubr.f32.mxu1 %v356_v55  ;;  %v397_v55 = vpop.permute.xlu1 %396 }
 0x10f   :  { %856 = vmatmul.mubr.f32.gmra.mxu1 %v357_v56 }
 0x110   :  { %858 = vmatprep.mubr.f32.mxu1 %v358_v57 }
 0x113   :  { %859 = vmatmul.mubr.f32.gmra.mxu1 %v359_v58 }
 0x114   :  { %861 = vmatprep.mubr.f32.mxu1 %v360_v59 }
 0x117   :  { %862 = vmatmul.mubr.f32.gmra.mxu1 %v361_v60  ;;  %v392_v60 = vpop.permute.xlu0 %391 }
 0x118   :  { %864 = vmatprep.mubr.f32.mxu1 %v362_v61 }
 0x11b   :  { %865 = vmatmul.mubr.f32.gmra.mxu1 %v363_v62 }
 0x11c   :  { %867 = vmatprep.mubr.f32.mxu1 %v364_v63  ;;  %v387_v63 = vpop.permute.xlu1 %386 }
 0x11f   :  { %868 = vmatmul.mubr.f32.gmra.mxu1 %v365_v0 }
 0x120   :  { %870 = vmatprep.mubr.f32.mxu1 %v366_v1 }
 0x123   :  { %871 = vmatmul.mubr.f32.gmra.mxu1 %v367_v2 }
 0x1c7   :  { %v1186_v4 = vpop.f32.mrf.mxu1 }
 0x1c8   :  { %v536_v61 = vadd.f32 %v1186_v4, %v392_v60  ;;  %v625_v4 = vld [vmem:[%s1225_s5] sm:$0xff] }
 0x1c9   :  { %v1188_v5 = vpop.f32.mrf.mxu1 }
 0x1ca   :  { %v531_v0 = vadd.f32 %v1188_v5, %v387_v63  ;;  %v610_v2 = vmax.f32 %v536_v61, 0.0 }
 0x1cb   :  { %v1190_v6 = vpop.f32.mrf.mxu1 }
 0x1cc   :  { %v546_v56 = vadd.f32 %v1190_v6, %v402_v54  ;;  %v609_v6 = vmax.f32 %v531_v0, 0.0 }
 0x1cd   :  { %v1192_v7 = vpop.f32.mrf.mxu1 }
 0x1ce   :  { %v541_v58 = vadd.f32 %v1192_v7, %v397_v55  ;;  %v612_v62 = vmax.f32 %v546_v56, 0.0  ;;  %v630_v7 = vpop.permute.xlu0 %629 }
 0x1cf   :  { %v857_v8 = vpop.f32.mrf.mxu1 }
 0x1d0   :  { %v556_v50 = vadd.f32 %v857_v8, %v412_v44  ;;  %v611_v1 = vmax.f32 %v541_v58, 0.0 }
 0x1d1   :  { %v550_v9 = vpop.f32.mrf.mxu1 }
 0x1d2   :  { %v551_v52 = vadd.f32 %v550_v9, %v407_v47  ;;  %v614_v57 = vmax.f32 %v556_v50, 0.0 }
 0x1d3   :  { %v860_v11 = vpop.f32.mrf.mxu1 }
 0x1d4   :  { %v566_v45 = vadd.f32 %v860_v11, %v422_v36  ;;  %v613_v59 = vmax.f32 %v551_v52, 0.0 }
 0x1d5   :  { %v560_v13 = vpop.f32.mrf.mxu1 }
 0x1d6   :  { %v561_v48 = vadd.f32 %v560_v13, %v417_v39  ;;  %v616_v51 = vmax.f32 %v566_v45, 0.0 }
 0x1d7   :  { %v863_v14 = vpop.f32.mrf.mxu1 }
 0x1d8   :  { %v576_v40 = vadd.f32 %v863_v14, %v432_v26  ;;  %v615_v53 = vmax.f32 %v561_v48, 0.0 }
 0x1d9   :  { %v570_v16 = vpop.f32.mrf.mxu1 }
 0x1da   :  { %v571_v42 = vadd.f32 %v570_v16, %v427_v31  ;;  %v618_v46 = vmax.f32 %v576_v40, 0.0 }
 0x1db   :  { %v866_v18 = vpop.f32.mrf.mxu1 }
 0x1dc   :  { %v586_v34 = vadd.f32 %v866_v18, %v442_v20  ;;  %v617_v49 = vmax.f32 %v571_v42, 0.0 }
 0x1dd   :  { %v580_v19 = vpop.f32.mrf.mxu1 }
 0x1de   :  { %v581_v37 = vadd.f32 %v580_v19, %v437_v22  ;;  %v620_v41 = vmax.f32 %v586_v34, 0.0 }
 0x1df   :  { %v869_v21 = vpop.f32.mrf.mxu1 }
 0x1e0   :  { %v596_v28 = vadd.f32 %v869_v21, %v452_v15  ;;  %v619_v43 = vmax.f32 %v581_v37, 0.0 }
 0x1e1   :  { %v590_v23 = vpop.f32.mrf.mxu1 }
 0x1e2   :  { %v591_v32 = vadd.f32 %v590_v23, %v447_v17  ;;  %v622_v35 = vmax.f32 %v596_v28, 0.0 }
 0x1e3   :  { %v872_v24 = vpop.f32.mrf.mxu1 }
 0x1e4   :  { %v606_v25 = vadd.f32 %v872_v24, %v462_v10  ;;  %v621_v38 = vmax.f32 %v591_v32, 0.0 }
 0x1e5   :  { %v600_v27 = vpop.f32.mrf.mxu1 }
 0x1e6   :  { %v624_v29 = vmax.f32 %v606_v25, 0.0  ;;  %v601_v30 = vadd.f32 %v600_v27, %v457_v12 }
 0x1e8   :  { %v623_v33 = vmax.f32 %v601_v30, 0.0  ;;  %874 = vmatpush3.msra.mxu0 %v624_v29 }
 0x1e9   :  { %875 = vmatprep.subr.mxu0 %v914_v3 }
 0x1ea   :  { %876 = vmatpush3.msra.mxu0 %v623_v33 }
 0x1eb   :  { %877 = vmatprep.subr.mxu0 %v914_v3 }
 0x1ec   :  { %878 = vmatpush3.msra.mxu0 %v622_v35 }
 0x1ed   :  { %879 = vmatprep.subr.mxu0 %v914_v3 }
 0x1ee   :  { %880 = vmatpush3.msra.mxu0 %v621_v38 }
 0x1ef   :  { %881 = vmatprep.subr.mxu0 %v914_v3 }
 0x1f0   :  { %882 = vmatpush3.msra.mxu0 %v620_v41 }
 0x1f1   :  { %883 = vmatprep.subr.mxu0 %v914_v3 }
 0x1f2   :  { %884 = vmatpush3.msra.mxu0 %v619_v43 }
 0x1f3   :  { %885 = vmatprep.subr.mxu0 %v914_v3 }
 0x1f4   :  { %886 = vmatpush3.msra.mxu0 %v618_v46 }
 0x1f5   :  { %887 = vmatprep.subr.mxu0 %v914_v3 }
 0x1f6   :  { %888 = vmatpush3.msra.mxu0 %v617_v49 }
 0x1f7   :  { %889 = vmatprep.subr.mxu0 %v914_v3 }
 0x1f8   :  { %890 = vmatpush3.msra.mxu0 %v616_v51 }
 0x1f9   :  { %891 = vmatprep.subr.mxu0 %v914_v3 }
 0x1fa   :  { %892 = vmatpush3.msra.mxu0 %v615_v53 }
 0x1fb   :  { %893 = vmatprep.subr.mxu0 %v914_v3 }
 0x1fc   :  { %894 = vmatpush3.msra.mxu0 %v614_v57 }
 0x1fd   :  { %895 = vmatprep.subr.mxu0 %v914_v3 }
 0x1fe   :  { %896 = vmatpush3.msra.mxu0 %v613_v59 }
 0x1ff   :  { %897 = vmatprep.subr.mxu0 %v914_v3 }
 0x200   :  { %898 = vmatpush3.msra.mxu0 %v612_v62 }
 0x201   :  { %899 = vmatprep.subr.mxu0 %v914_v3 }
 0x202   :  { %900 = vmatpush3.msra.mxu0 %v611_v1 }
 0x203   :  { %901 = vmatprep.subr.mxu0 %v914_v3 }
 0x204   :  { %902 = vmatpush3.msra.mxu0 %v610_v2 }
 0x205   :  { %903 = vmatprep.subr.mxu0 %v914_v3 }
 0x206   :  { %904 = vmatpush3.msra.mxu0 %v609_v6 }
 0x207   :  { %906 = vmatmul.mubr.f32.vlgmr.msra.gmra.mxu0 %v625_v4 }
 0x2c7   :  { %v698_v5 = vpop.f32.mrf.mxu0 }
 0x2c8   :  { %v699_v8 = vadd.f32 %v698_v5, %v630_v7 }
 0x2c9   :  { %v907_v9 = vpop.f32.mrf.mxu0 }
 0x2ca   :  { %703 = vst.msk [vmem:[%s1226_s7] sm:$0xff] %vm702_vm2, %v699_v8 }

// kernel: q_network_forward.1
= control target key start
LH: loop header
LB: loop body
LE: loop exit
PB: predicated region body
PF: predicated region fallthrough
CT: control target
= control target key end

     0   :  { %vm139_vm0 = vcmask 130048   ;;  %v913_v2 = vmov 0   ;;  %vm915_vm1 = vmmov 0   ;;  %vm702_vm2 = vcmask 64512   ;;  %s1219_s0 = inlined_call_operand.vmem [shape: f32[8,16], index: 0, kind: input, shape index: {}]   ;;  %s1220_s1 = inlined_call_operand.vmem [shape: f32[128,16], index: 1, kind: input, shape index: {}]   ;;  %s1221_s2 = inlined_call_operand.vmem [shape: f32[128,1], index: 2, kind: input, shape index: {}]   ;;  %s1222_s4 = inlined_call_operand.vmem [shape: f32[128,1], index: 4, kind: input, shape index: {}]   ;;  %s1223_s6 = inlined_call_operand.vmem [shape: f32[8,1], index: 6, kind: input, shape index: {}]   ;;  %s1224_s3 = inlined_call_operand.vmem [shape: f32[128,128], index: 3, kind: input, shape index: {}]   ;;  %s1225_s5 = inlined_call_operand.vmem [shape: f32[8,128], index: 5, kind: input, shape index: {}]   ;;  %s1226_s7 = inlined_call_operand.vmem [shape: f32[8,8], index: 7, kind: output, shape index: {}]  }
   0x1   :  { %v26_v0 = vld [vmem:[%s1219_s0] sm:$0xff]  ;;  %911 = vset.pattern.permute.xlu0 %v913_v2  ;;  %912 = vset.pattern.permute.xlu1 %v913_v2  ;;  %v28_v3 = vld [vmem:[%s1220_s1 + $0x8] sm:$0xff]  ;;  %v29_v4 = vld [vmem:[%s1220_s1 + $0x10] sm:$0xff] }
   0x2   :  { %v27_v1 = vld [vmem:[%s1220_s1] sm:$0xff]  ;;  %791 = vmatprep.subr.msk.mxu0 %vm139_vm0, %v26_v0  ;;  %v58_v5 = vld [vmem:[%s1221_s2 + $0x78] sm:$0xff]  ;;  %v56_v7 = vld [vmem:[%s1221_s2 + $0x68] sm:$0xff] }
   0x3   :  { %793 = vmatprep.mubr.msk.f32.mxu0 %vm139_vm0, %v27_v1  ;;  %792 = vmatpush3.xpose.msk.msra.mxu0 %vm139_vm0, %v26_v0  ;;  %v30_v6 = vld [vmem:[%s1220_s1 + $0x18] sm:$0xff]  ;;  %v31_v8 = vld [vmem:[%s1220_s1 + $0x20] sm:$0xff]  ;;  %v57_v9 = vld [vmem:[%s1221_s2 + $0x70] sm:$0xff] }
   0x4   :  { %136 = vperm.xlu0 %911, %v58_v5   ;;  %126 = vperm.xlu1 %912, %v56_v7   ;;  %v55_v10 = vld [vmem:[%s1221_s2 + $0x60] sm:$0xff]  ;;  %v32_v11 = vld [vmem:[%s1220_s1 + $0x28] sm:$0xff]  ;;  %v33_v12 = vld [vmem:[%s1220_s1 + $0x30] sm:$0xff] }
   0x5   :  { %v54_v13 = vld [vmem:[%s1221_s2 + $0x58] sm:$0xff]  ;;  %v53_v14 = vld [vmem:[%s1221_s2 + $0x50] sm:$0xff]  ;;  %v35_v16 = vld [vmem:[%s1220_s1 + $0x40] sm:$0xff] }
   0x6   :  { %794 = vmatmul.mubr.msk.f32.vlgmr.msra.gmra.mxu0 %vm139_vm0, %v28_v3  ;;  %v34_v15 = vld [vmem:[%s1220_s1 + $0x38] sm:$0xff]  ;;  %v52_v17 = vld [vmem:[%s1221_s2 + $0x48] sm:$0xff]  ;;  %v51_v18 = vld [vmem:[%s1221_s2 + $0x40] sm:$0xff] }
   0x7   :  { %796 = vmatprep.mubr.msk.f32.mxu0 %vm139_vm0, %v29_v4  ;;  %v36_v19 = vld [vmem:[%s1220_s1 + $0x48] sm:$0xff]  ;;  %v37_v20 = vld [vmem:[%s1220_s1 + $0x50] sm:$0xff]  ;;  %v50_v21 = vld [vmem:[%s1221_s2 + $0x38] sm:$0xff] }
   0x8   :  { %131 = vperm.xlu0 %911, %v57_v9   ;;  %121 = vperm.xlu1 %912, %v55_v10   ;;  %v49_v22 = vld [vmem:[%s1221_s2 + $0x30] sm:$0xff]  ;;  %v38_v23 = vld [vmem:[%s1220_s1 + $0x58] sm:$0xff]  ;;  %v39_v24 = vld [vmem:[%s1220_s1 + $0x60] sm:$0xff] }
   0x9   :  { %v48_v25 = vld [vmem:[%s1221_s2 + $0x28] sm:$0xff]  ;;  %v47_v26 = vld [vmem:[%s1221_s2 + $0x20] sm:$0xff]  ;;  %v41_v28 = vld [vmem:[%s1220_s1 + $0x70] sm:$0xff] }
   0xa   :  { %797 = vmatmul.mubr.msk.f32.gmra.mxu0 %vm139_vm0, %v30_v6  ;;  %v40_v27 = vld [vmem:[%s1220_s1 + $0x68] sm:$0xff]  ;;  %v46_v29 = vld [vmem:[%s1221_s2 + $0x18] sm:$0xff]  ;;  %v45_v30 = vld [vmem:[%s1221_s2 + $0x10] sm:$0xff] }
   0xb   :  { %799 = vmatprep.mubr.msk.f32.mxu0 %vm139_vm0, %v31_v8  ;;  %v42_v31 = vld [vmem:[%s1220_s1 + $0x78] sm:$0xff]  ;;  %v44_v32 = vld [vmem:[%s1221_s2 + $0x8] sm:$0xff]  ;;  %v43_v33 = vld [vmem:[%s1221_s2] sm:$0xff] }
   0xc   :  { %116 = vperm.xlu0 %911, %v54_v13   ;;  %111 = vperm.xlu1 %912, %v53_v14   ;;  %v383_v34 = vld [vmem:[%s1222_s4 + $0x78] sm:$0xff]  ;;  %v382_v35 = vld [vmem:[%s1222_s4 + $0x70] sm:$0xff]  ;;  %v381_v36 = vld [vmem:[%s1222_s4 + $0x68] sm:$0xff] }
   0xd   :  { %v380_v37 = vld [vmem:[%s1222_s4 + $0x60] sm:$0xff]  ;;  %v379_v38 = vld [vmem:[%s1222_s4 + $0x58] sm:$0xff]  ;;  %v378_v39 = vld [vmem:[%s1222_s4 + $0x50] sm:$0xff] }
   0xe   :  { %800 = vmatmul.mubr.msk.f32.gmra.mxu0 %vm139_vm0, %v32_v11  ;;  %v377_v40 = vld [vmem:[%s1222_s4 + $0x48] sm:$0xff]  ;;  %v376_v41 = vld [vmem:[%s1222_s4 + $0x40] sm:$0xff]  ;;  %v375_v42 = vld [vmem:[%s1222_s4 + $0x38] sm:$0xff] }
   0xf   :  { %802 = vmatprep.mubr.msk.f32.mxu0 %vm139_vm0, %v33_v12  ;;  %v374_v43 = vld [vmem:[%s1222_s4 + $0x30] sm:$0xff]  ;;  %v373_v44 = vld [vmem:[%s1222_s4 + $0x28] sm:$0xff]  ;;  %v372_v45 = vld [vmem:[%s1222_s4 + $0x20] sm:$0xff] }
  0x10   :  { %106 = vperm.xlu0 %911, %v52_v17   ;;  %101 = vperm.xlu1 %912, %v51_v18   ;;  %v371_v46 = vld [vmem:[%s1222_s4 + $0x18] sm:$0xff]  ;;  %v370_v47 = vld [vmem:[%s1222_s4 + $0x10] sm:$0xff]  ;;  %v369_v48 = vld [vmem:[%s1222_s4 + $0x8] sm:$0xff] }
  0x11   :  { %v368_v49 = vld [vmem:[%s1222_s4] sm:$0xff] }
  0x12   :  { %803 = vmatmul.mubr.msk.f32.gmra.mxu0 %vm139_vm0, %v34_v15  ;;  %v626_v50 = vld [vmem:[%s1223_s6] sm:$0xff] }
  0x13   :  { %805 = vmatprep.mubr.msk.f32.mxu0 %vm139_vm0, %v35_v16  ;;  %v352_v51 = vld [vmem:[%s1224_s3] sm:$0xff] }
  0x14   :  { %96 = vperm.xlu0 %911, %v50_v21   ;;  %91 = vperm.xlu1 %912, %v49_v22  }
  0x15   :  { %849 = vmatprep.mubr.f32.mxu1 %v352_v51 }
  0x16   :  { %806 = vmatmul.mubr.msk.f32.gmra.mxu0 %vm139_vm0, %v36_v19 }
  0x17   :  { %808 = vmatprep.mubr.msk.f32.mxu0 %vm139_vm0, %v37_v20 }
  0x18   :  { %86 = vperm.xlu0 %911, %v48_v25   ;;  %81 = vperm.xlu1 %912, %v47_v26  }
  0x1a   :  { %809 = vmatmul.mubr.msk.f32.gmra.mxu0 %vm139_vm0, %v38_v23 }
  0x1b   :  { %811 = vmatprep.mubr.msk.f32.mxu0 %vm139_vm0, %v39_v24 }
  0x1c   :  { %76 = vperm.xlu0 %911, %v46_v29   ;;  %71 = vperm.xlu1 %912, %v45_v30  }
  0x1e   :  { %812 = vmatmul.mubr.msk.f32.gmra.mxu0 %vm139_vm0, %v40_v27 }
  0x1f   :  { %814 = vmatprep.mubr.msk.f32.mxu0 %vm139_vm0, %v41_v28 }
  0x20   :  { %66 = vperm.xlu0 %911, %v44_v32   ;;  %61 = vperm.xlu1 %912, %v43_v33  }
  0x22   :  { %815 = vmatmul.mubr.msk.f32.gmra.mxu0 %vm139_vm0, %v42_v31 }
  0x24   :  { %461 = vperm.xlu0 %911, %v383_v34   ;;  %456 = vperm.xlu1 %912, %v382_v35  }
  0x28   :  { %451 = vperm.xlu0 %911, %v381_v36   ;;  %446 = vperm.xlu1 %912, %v380_v37  }
  0x2c   :  { %441 = vperm.xlu0 %911, %v379_v38   ;;  %436 = vperm.xlu1 %912, %v378_v39  }
  0x30   :  { %431 = vperm.xlu0 %911, %v377_v40   ;;  %426 = vperm.xlu1 %912, %v376_v41  }
  0x34   :  { %421 = vperm.xlu0 %911, %v375_v42   ;;  %416 = vperm.xlu1 %912, %v374_v43  }
  0x38   :  { %411 = vperm.xlu0 %911, %v373_v44   ;;  %406 = vperm.xlu1 %912, %v372_v45  }
  0x3c   :  { %401 = vperm.xlu0 %911, %v371_v46   ;;  %396 = vperm.xlu1 %912, %v370_v47  }
  0x40   :  { %391 = vperm.xlu0 %911, %v369_v48   ;;  %386 = vperm.xlu1 %912, %v368_v49  }
  0x44   :  { %629 = vperm.xlu0 %911, %v626_v50  }
  0x7f   :  { %v137_v58 = vpop.permute.xlu0 %136  ;;  %v127_v60 = vpop.permute.xlu1 %126 }
  0x83   :  { %v132_v63 = vpop.permute.xlu0 %131  ;;  %v122_v1 = vpop.permute.xlu1 %121 }
  0x87   :  { %v117_v4 = vpop.permute.xlu0 %116  ;;  %v112_v6 = vpop.permute.xlu1 %111 }
  0x8b   :  { %v107_v10 = vpop.permute.xlu0 %106  ;;  %v102_v15 = vpop.permute.xlu1 %101 }
  0x8f   :  { %v97_v20 = vpop.permute.xlu0 %96  ;;  %v92_v23 = vpop.permute.xlu1 %91 }
  0x93   :  { %v87_v28 = vpop.permute.xlu0 %86  ;;  %v82_v31 = vpop.permute.xlu1 %81 }
  0x97   :  { %v77_v36 = vpop.permute.xlu0 %76  ;;  %v72_v39 = vpop.permute.xlu1 %71 }
  0x9b   :  { %v67_v44 = vpop.permute.xlu0 %66  ;;  %v62_v47 = vpop.permute.xlu1 %61 }
  0xc6   :  { %v1127_v52 = vpop.f32.mrf.mxu0 }
  0xc7   :  { %v263_v45 = vadd.f32 %v1127_v52, %v67_v44  ;;  %v354_v52 = vld [vmem:[%s1224_s3 + $0x10] sm:$0xff] }
  0xc8   :  { %v1129_v53 = vpop.f32.mrf.mxu0 }
  0xc9   :  { %v258_v48 = vadd.f32 %v1129_v53, %v62_v47  ;;  %v337_v50 = vmax.f32 %v263_v45, 0.0  ;;  %v355_v53 = vld [vmem:[%s1224_s3 + $0x18] sm:$0xff] }
  0xca   :  { %v1131_v54 = vpop.f32.mrf.mxu0 }
  0xcb   :  { %v273_v40 = vadd.f32 %v1131_v54, %v77_v36  ;;  %v336_v51 = vmax.f32 %v258_v48, 0.0  ;;  %v353_v54 = vld [vmem:[%s1224_s3 + $0x8] sm:$0xff] }
  0xcc   :  { %v1133_v55 = vpop.f32.mrf.mxu0 }
  0xcd   :  { %v268_v42 = vadd.f32 %v1133_v55, %v72_v39  ;;  %v339_v46 = vmax.f32 %v273_v40, 0.0  ;;  %v356_v55 = vld [vmem:[%s1224_s3 + $0x20] sm:$0xff] }
  0xce   :  { %v801_v56 = vpop.f32.mrf.mxu0 }
  0xcf   :  { %v283_v34 = vadd.f32 %v801_v56, %v87_v28  ;;  %v338_v49 = vmax.f32 %v268_v42, 0.0  ;;  %v357_v56 = vld [vmem:[%s1224_s3 + $0x28] sm:$0xff] }
  0xd0   :  { %v277_v57 = vpop.f32.mrf.mxu0 }
  0xd1   :  { %v278_v37 = vadd.f32 %v277_v57, %v82_v31  ;;  %v341_v41 = vmax.f32 %v283_v34, 0.0  ;;  %v358_v57 = vld [vmem:[%s1224_s3 + $0x30] sm:$0xff] }
  0xd2   :  { %v804_v59 = vpop.f32.mrf.mxu0 }
  0xd3   :  { %v293_v29 = vadd.f32 %v804_v59, %v97_v20  ;;  %v340_v43 = vmax.f32 %v278_v37, 0.0  ;;  %v360_v59 = vld [vmem:[%s1224_s3 + $0x40] sm:$0xff] }
  0xd4   :  { %v287_v61 = vpop.f32.mrf.mxu0 }
  0xd5   :  { %v288_v32 = vadd.f32 %v287_v61, %v92_v23  ;;  %v343_v35 = vmax.f32 %v293_v29, 0.0  ;;  %v362_v61 = vld [vmem:[%s1224_s3 + $0x50] sm:$0xff] }
  0xd6   :  { %v807_v62 = vpop.f32.mrf.mxu0 }
  0xd7   :  { %v303_v24 = vadd.f32 %v807_v62, %v107_v10  ;;  %v342_v38 = vmax.f32 %v288_v32, 0.0  ;;  %v363_v62 = vld [vmem:[%s1224_s3 + $0x58] sm:$0xff]  ;;  %v462_v10 = vpop.permute.xlu0 %461 }
  0xd8   :  { %v297_v0 = vpop.f32.mrf.mxu0 }
  0xd9   :  { %v298_v26 = vadd.f32 %v297_v0, %v102_v15  ;;  %v345_v30 = vmax.f32 %v303_v24, 0.0  ;;  %v365_v0 = vld [vmem:[%s1224_s3 + $0x68] sm:$0xff] }
  0xda   :  { %v810_v2 = vpop.f32.mrf.mxu0 }
  0xdb   :  { %v313_v18 = vadd.f32 %v810_v2, %v117_v4  ;;  %v344_v33 = vmax.f32 %v298_v26, 0.0  ;;  %v367_v2 = vld [vmem:[%s1224_s3 + $0x78] sm:$0xff]  ;;  %v452_v15 = vpop.permute.xlu0 %451 }
  0xdc   :  { %v307_v3 = vpop.f32.mrf.mxu0 }
  0xdd   :  { %v308_v21 = vadd.f32 %v307_v3, %v112_v6  ;;  %v347_v25 = vmax.f32 %v313_v18, 0.0  ;;  %v914_v3 = vmov 0.0  }
  0xde   :  { %v813_v5 = vpop.f32.mrf.mxu0  ;;  %873 = vmatprep.subr.mxu0 %v914_v3  ;;  %905 = vmatprep.mubr.msk.f32.mxu0 %vm915_vm1, %v914_v3 }
  0xdf   :  { %v323_v12 = vadd.f32 %v813_v5, %v127_v60  ;;  %v346_v27 = vmax.f32 %v308_v21, 0.0  ;;  %v361_v60 = vld [vmem:[%s1224_s3 + $0x48] sm:$0xff]  ;;  %v442_v20 = vpop.permute.xlu0 %441 }
  0xe0   :  { %v317_v7 = vpop.f32.mrf.mxu0 }
  0xe1   :  { %v318_v16 = vadd.f32 %v317_v7, %v122_v1  ;;  %v349_v19 = vmax.f32 %v323_v12, 0.0  ;;  %v366_v1 = vld [vmem:[%s1224_s3 + $0x70] sm:$0xff]  ;;  %v457_v12 = vpop.permute.xlu1 %456 }
  0xe2   :  { %v816_v8 = vpop.f32.mrf.mxu0 }
  0xe3   :  { %v333_v9 = vadd.f32 %v816_v8, %v137_v58  ;;  %v348_v22 = vmax.f32 %v318_v16, 0.0  ;;  %v359_v58 = vld [vmem:[%s1224_s3 + $0x38] sm:$0xff]  ;;  %v432_v26 = vpop.permute.xlu0 %431 }
  0xe4   :  { %v327_v11 = vpop.f32.mrf.mxu0 }
  0xe5   :  { %v351_v13 = vmax.f32 %v333_v9, 0.0  ;;  %v328_v14 = vadd.f32 %v327_v11, %v132_v63  ;;  %v364_v63 = vld [vmem:[%s1224_s3 + $0x60] sm:$0xff] }
  0xe7   :  { %v350_v17 = vmax.f32 %v328_v14, 0.0  ;;  %817 = vmatprep.subr.mxu1 %v351_v13  ;;  %v422_v36 = vpop.permute.xlu0 %421 }
  0xe8   :  { %818 = vmatpush3.msra.mxu1 %v351_v13 }
  0xe9   :  { %819 = vmatprep.subr.mxu1 %v350_v17 }
  0xea   :  { %820 = vmatpush3.msra.mxu1 %v350_v17  ;;  %v447_v17 = vpop.permute.xlu1 %446 }
  0xeb   :  { %821 = vmatprep.subr.mxu1 %v349_v19  ;;  %v412_v44 = vpop.permute.xlu0 %411 }
  0xec   :  { %822 = vmatpush3.msra.mxu1 %v349_v19 }
  0xed   :  { %823 = vmatprep.subr.mxu1 %v348_v22 }
  0xee   :  { %824 = vmatpush3.msra.mxu1 %v348_v22  ;;  %v437_v22 = vpop.permute.xlu1 %436 }
  0xef   :  { %825 = vmatprep.subr.mxu1 %v347_v25 }
  0xf0   :  { %826 = vmatpush3.msra.mxu1 %v347_v25 }
  0xf1   :  { %827 = vmatprep.subr.mxu1 %v346_v27 }
  0xf2   :  { %828 = vmatpush3.msra.mxu1 %v346_v27  ;;  %v427_v31 = vpop.permute.xlu1 %426 }
  0xf3   :  { %829 = vmatprep.subr.mxu1 %v345_v30 }
  0xf4   :  { %830 = vmatpush3.msra.mxu1 %v345_v30 }
  0xf5   :  { %831 = vmatprep.subr.mxu1 %v344_v33 }
  0xf6   :  { %832 = vmatpush3.msra.mxu1 %v344_v33  ;;  %v417_v39 = vpop.permute.xlu1 %416 }
  0xf7   :  { %833 = vmatprep.subr.mxu1 %v343_v35 }
  0xf8   :  { %834 = vmatpush3.msra.mxu1 %v343_v35 }
  0xf9   :  { %835 = vmatprep.subr.mxu1 %v342_v38 }
  0xfa   :  { %836 = vmatpush3.msra.mxu1 %v342_v38  ;;  %v407_v47 = vpop.permute.xlu1 %406 }
  0xfb   :  { %837 = vmatprep.subr.mxu1 %v341_v41 }
  0xfc   :  { %838 = vmatpush3.msra.mxu1 %v341_v41 }
  0xfd   :  { %839 = vmatprep.subr.mxu1 %v340_v43 }
  0xfe   :  { %840 = vmatpush3.msra.mxu1 %v340_v43 }
  0xff   :  { %841 = vmatprep.subr.mxu1 %v339_v46 }
 0x100   :  { %842 = vmatpush3.msra.mxu1 %v339_v46 }
 0x101   :  { %843 = vmatprep.subr.mxu1 %v338_v49 }
 0x102   :  { %844 = vmatpush3.msra.mxu1 %v338_v49 }
 0x103   :  { %845 = vmatprep.subr.mxu1 %v337_v50 }
 0x104   :  { %846 = vmatpush3.msra.mxu1 %v337_v50 }
 0x105   :  { %847 = vmatprep.subr.mxu1 %v336_v51 }
 0x106   :  { %848 = vmatpush3.msra.mxu1 %v336_v51 }
 0x107   :  { %850 = vmatmul.mubr.f32.vlgmr.msra.gmra.mxu1 %v353_v54  ;;  %v402_v54 = vpop.permute.xlu0 %401 }
 0x108   :  { %852 = vmatprep.mubr.f32.mxu1 %v354_v52 }
 0x10b   :  { %853 = vmatmul.mubr.f32.gmra.mxu1 %v355_v53 }
 0x10c   :  { %855 = vmatprep.mubr.f32.mxu1 %v356_v55  ;;  %v397_v55 = vpop.permute.xlu1 %396 }
 0x10f   :  { %856 = vmatmul.mubr.f32.gmra.mxu1 %v357_v56 }
 0x110   :  { %858 = vmatprep.mubr.f32.mxu1 %v358_v57 }
 0x113   :  { %859 = vmatmul.mubr.f32.gmra.mxu1 %v359_v58 }
 0x114   :  { %861 = vmatprep.mubr.f32.mxu1 %v360_v59 }
 0x117   :  { %862 = vmatmul.mubr.f32.gmra.mxu1 %v361_v60  ;;  %v392_v60 = vpop.permute.xlu0 %391 }
 0x118   :  { %864 = vmatprep.mubr.f32.mxu1 %v362_v61 }
 0x11b   :  { %865 = vmatmul.mubr.f32.gmra.mxu1 %v363_v62 }
 0x11c   :  { %867 = vmatprep.mubr.f32.mxu1 %v364_v63  ;;  %v387_v63 = vpop.permute.xlu1 %386 }
 0x11f   :  { %868 = vmatmul.mubr.f32.gmra.mxu1 %v365_v0 }
 0x120   :  { %870 = vmatprep.mubr.f32.mxu1 %v366_v1 }
 0x123   :  { %871 = vmatmul.mubr.f32.gmra.mxu1 %v367_v2 }
 0x1c7   :  { %v1186_v4 = vpop.f32.mrf.mxu1 }
 0x1c8   :  { %v536_v61 = vadd.f32 %v1186_v4, %v392_v60  ;;  %v625_v4 = vld [vmem:[%s1225_s5] sm:$0xff] }
 0x1c9   :  { %v1188_v5 = vpop.f32.mrf.mxu1 }
 0x1ca   :  { %v531_v0 = vadd.f32 %v1188_v5, %v387_v63  ;;  %v610_v2 = vmax.f32 %v536_v61, 0.0 }
 0x1cb   :  { %v1190_v6 = vpop.f32.mrf.mxu1 }
 0x1cc   :  { %v546_v56 = vadd.f32 %v1190_v6, %v402_v54  ;;  %v609_v6 = vmax.f32 %v531_v0, 0.0 }
 0x1cd   :  { %v1192_v7 = vpop.f32.mrf.mxu1 }
 0x1ce   :  { %v541_v58 = vadd.f32 %v1192_v7, %v397_v55  ;;  %v612_v62 = vmax.f32 %v546_v56, 0.0  ;;  %v630_v7 = vpop.permute.xlu0 %629 }
 0x1cf   :  { %v857_v8 = vpop.f32.mrf.mxu1 }
 0x1d0   :  { %v556_v50 = vadd.f32 %v857_v8, %v412_v44  ;;  %v611_v1 = vmax.f32 %v541_v58, 0.0 }
 0x1d1   :  { %v550_v9 = vpop.f32.mrf.mxu1 }
 0x1d2   :  { %v551_v52 = vadd.f32 %v550_v9, %v407_v47  ;;  %v614_v57 = vmax.f32 %v556_v50, 0.0 }
 0x1d3   :  { %v860_v11 = vpop.f32.mrf.mxu1 }
 0x1d4   :  { %v566_v45 = vadd.f32 %v860_v11, %v422_v36  ;;  %v613_v59 = vmax.f32 %v551_v52, 0.0 }
 0x1d5   :  { %v560_v13 = vpop.f32.mrf.mxu1 }
 0x1d6   :  { %v561_v48 = vadd.f32 %v560_v13, %v417_v39  ;;  %v616_v51 = vmax.f32 %v566_v45, 0.0 }
 0x1d7   :  { %v863_v14 = vpop.f32.mrf.mxu1 }
 0x1d8   :  { %v576_v40 = vadd.f32 %v863_v14, %v432_v26  ;;  %v615_v53 = vmax.f32 %v561_v48, 0.0 }
 0x1d9   :  { %v570_v16 = vpop.f32.mrf.mxu1 }
 0x1da   :  { %v571_v42 = vadd.f32 %v570_v16, %v427_v31  ;;  %v618_v46 = vmax.f32 %v576_v40, 0.0 }
 0x1db   :  { %v866_v18 = vpop.f32.mrf.mxu1 }
 0x1dc   :  { %v586_v34 = vadd.f32 %v866_v18, %v442_v20  ;;  %v617_v49 = vmax.f32 %v571_v42, 0.0 }
 0x1dd   :  { %v580_v19 = vpop.f32.mrf.mxu1 }
 0x1de   :  { %v581_v37 = vadd.f32 %v580_v19, %v437_v22  ;;  %v620_v41 = vmax.f32 %v586_v34, 0.0 }
 0x1df   :  { %v869_v21 = vpop.f32.mrf.mxu1 }
 0x1e0   :  { %v596_v28 = vadd.f32 %v869_v21, %v452_v15  ;;  %v619_v43 = vmax.f32 %v581_v37, 0.0 }
 0x1e1   :  { %v590_v23 = vpop.f32.mrf.mxu1 }
 0x1e2   :  { %v591_v32 = vadd.f32 %v590_v23, %v447_v17  ;;  %v622_v35 = vmax.f32 %v596_v28, 0.0 }
 0x1e3   :  { %v872_v24 = vpop.f32.mrf.mxu1 }
 0x1e4   :  { %v606_v25 = vadd.f32 %v872_v24, %v462_v10  ;;  %v621_v38 = vmax.f32 %v591_v32, 0.0 }
 0x1e5   :  { %v600_v27 = vpop.f32.mrf.mxu1 }
 0x1e6   :  { %v624_v29 = vmax.f32 %v606_v25, 0.0  ;;  %v601_v30 = vadd.f32 %v600_v27, %v457_v12 }
 0x1e8   :  { %v623_v33 = vmax.f32 %v601_v30, 0.0  ;;  %874 = vmatpush3.msra.mxu0 %v624_v29 }
 0x1e9   :  { %875 = vmatprep.subr.mxu0 %v914_v3 }
 0x1ea   :  { %876 = vmatpush3.msra.mxu0 %v623_v33 }
 0x1eb   :  { %877 = vmatprep.subr.mxu0 %v914_v3 }
 0x1ec   :  { %878 = vmatpush3.msra.mxu0 %v622_v35 }
 0x1ed   :  { %879 = vmatprep.subr.mxu0 %v914_v3 }
 0x1ee   :  { %880 = vmatpush3.msra.mxu0 %v621_v38 }
 0x1ef   :  { %881 = vmatprep.subr.mxu0 %v914_v3 }
 0x1f0   :  { %882 = vmatpush3.msra.mxu0 %v620_v41 }
 0x1f1   :  { %883 = vmatprep.subr.mxu0 %v914_v3 }
 0x1f2   :  { %884 = vmatpush3.msra.mxu0 %v619_v43 }
 0x1f3   :  { %885 = vmatprep.subr.mxu0 %v914_v3 }
 0x1f4   :  { %886 = vmatpush3.msra.mxu0 %v618_v46 }
 0x1f5   :  { %887 = vmatprep.subr.mxu0 %v914_v3 }
 0x1f6   :  { %888 = vmatpush3.msra.mxu0 %v617_v49 }
 0x1f7   :  { %889 = vmatprep.subr.mxu0 %v914_v3 }
 0x1f8   :  { %890 = vmatpush3.msra.mxu0 %v616_v51 }
 0x1f9   :  { %891 = vmatprep.subr.mxu0 %v914_v3 }
 0x1fa   :  { %892 = vmatpush3.msra.mxu0 %v615_v53 }
 0x1fb   :  { %893 = vmatprep.subr.mxu0 %v914_v3 }
 0x1fc   :  { %894 = vmatpush3.msra.mxu0 %v614_v57 }
 0x1fd   :  { %895 = vmatprep.subr.mxu0 %v914_v3 }
 0x1fe   :  { %896 = vmatpush3.msra.mxu0 %v613_v59 }
 0x1ff   :  { %897 = vmatprep.subr.mxu0 %v914_v3 }
 0x200   :  { %898 = vmatpush3.msra.mxu0 %v612_v62 }
 0x201   :  { %899 = vmatprep.subr.mxu0 %v914_v3 }
 0x202   :  { %900 = vmatpush3.msra.mxu0 %v611_v1 }
 0x203   :  { %901 = vmatprep.subr.mxu0 %v914_v3 }
 0x204   :  { %902 = vmatpush3.msra.mxu0 %v610_v2 }
 0x205   :  { %903 = vmatprep.subr.mxu0 %v914_v3 }
 0x206   :  { %904 = vmatpush3.msra.mxu0 %v609_v6 }
 0x207   :  { %906 = vmatmul.mubr.f32.vlgmr.msra.gmra.mxu0 %v625_v4 }
 0x2c7   :  { %v698_v5 = vpop.f32.mrf.mxu0 }
 0x2c8   :  { %v699_v8 = vadd.f32 %v698_v5, %v630_v7 }
 0x2c9   :  { %v907_v9 = vpop.f32.mrf.mxu0 }
 0x2ca   :  { %703 = vst.msk [vmem:[%s1226_s7] sm:$0xff] %vm702_vm2, %v699_v8 }

</bundles_post_ra>
